<compile_context>
chip_gen: v7x
topology: tpu7x:2x2x1
jax: 0.10.0
libtpu: 0.0.40
codegen_flags: <defaults>
</compile_context>

<pallas_src>
import functools

import jax
import jax.numpy as jnp
from jax import lax
from jax.experimental import pallas as pl
from jax.experimental.pallas import tpu as pltpu

_INV_SQRT2 = 0.7071067811865476


def _round_up(x, m):
    return (x + m - 1) // m * m


def _cdiv(a, b):
    return (a + b - 1) // b


def _device_vmem_bytes():
    try:
        return int(pltpu.get_tpu_info().vmem_capacity_bytes)
    except Exception:
        return 64 * 2**20  # conservative fallback (v7x per-TensorCore VMEM)


def _vmem_bytes(rows, cols, itemsize):
    """Bytes one [rows, cols] buffer occupies in VMEM (sublane/lane padding included)."""
    pack = max(1, 4 // itemsize)
    return _round_up(max(rows, 1), 8 * pack) * _round_up(max(cols, 1), 128) * itemsize


def _estimate_vmem(c, hid_pad, hid_chunk, cout, tn):
    est = 0
    # double-buffered per-step blocks
    est += 2 * _vmem_bytes(c, tn, 4)          # x tile (f32)
    est += 2 * _vmem_bytes(cout, tn, 4)       # y tile (f32)
    est += 2 * _vmem_bytes(1, tn, 4)          # token-mask tile
    # grid-invariant, single-buffered residents
    est += _vmem_bytes(hid_pad, c, 2)         # masked W1 (bf16)
    est += _vmem_bytes(cout, hid_pad, 2)      # masked W2 (bf16)
    est += _vmem_bytes(hid_pad, 1, 4) + _vmem_bytes(cout, 1, 4)   # biases
    # in-kernel temporaries (per hidden chunk)
    est += _vmem_bytes(c, tn, 2)                                   # gated x (bf16)
    est += _vmem_bytes(hid_chunk, tn, 4) + _vmem_bytes(hid_chunk, tn, 2)  # h (f32 + bf16)
    est += _vmem_bytes(cout, tn, 4)                                # y accumulator
    return est


def _resident_spec(shape, index_map):
    # Constant index_map -> block is grid-invariant; a single VMEM buffer suffices
    # (halves resident-weight VMEM).  Fall back gracefully if pipeline_mode / Buffered
    # is unavailable in this JAX version.
    try:
        return pl.BlockSpec(shape, index_map, pipeline_mode=pl.Buffered(1))
    except Exception:
        return pl.BlockSpec(shape, index_map)


def _mlp2_kernel(x_ref, w1_ref, b1_ref, w2_ref, b2_ref, y_ref, tmask_ref,
                 *, hid_chunk, num_chunks):
    # x tile: [C, tn] f32 (channels on sublanes, tokens on lanes)
    x = x_ref[0]

    # --- TokenSelectGateSTE forward: step(mean_c(|x| - 0)) -> {0,1}, lane-dense [1, tn]
    t_mask = (jnp.sum(jnp.abs(x), axis=0, keepdims=True) > 0.0).astype(jnp.float32)
    tmask_ref[0] = t_mask

    # gated input for fc1, bf16 on the MXU (f32 accumulation below)
    xm = (x * t_mask).astype(jnp.bfloat16)                          # [C, tn]
    tn = x.shape[1]
    cout = y_ref.shape[1]

    # --- hot path, chunked over the hidden dim so chunk k+1's matmul (MXU slot) overlaps
    # chunk k's erf-GELU (VALU/EUP slots).  Accumulator starts at b2 (folds the fc2 bias).
    # Zero-padded hidden rows (if any) contribute exactly 0: GELU(0)=0 and w2 pad cols = 0.
    acc = jnp.broadcast_to(b2_ref[...], (cout, tn))                  # [Cout, tn] f32
    for k in range(num_chunks):                                      # static, fully unrolled
        sl = pl.ds(k * hid_chunk, hid_chunk)
        h = jnp.dot(w1_ref[sl, :], xm, preferred_element_type=jnp.float32)
        h = h + b1_ref[sl, :]                                        # [chunk, tn]
        # exact-erf GELU (torch nn.GELU default); f32 keeps v5e (no bf16 VPU) correct.
        h = 0.5 * h * (1.0 + lax.erf(h * _INV_SQRT2))
        h = (h * t_mask).astype(jnp.bfloat16)                        # token gate, back to bf16
        acc = acc + jnp.dot(w2_ref[:, sl], h, preferred_element_type=jnp.float32)
    y_ref[0] = acc.astype(y_ref.dtype)
    # Dropout (drop=0.0) is the identity in this forward pass.


@functools.partial(jax.jit, static_argnames=("token_tile",))
def mlp2_forward(x, w1, b1, w2, b2, *, token_tile=None):
    """x: [B, C, H, W]; w1: [Hid, C]; b1: [Hid]; w2: [Cout, Hid]; b2: [Cout]."""
    bs, c, h, w = x.shape
    hw = h * w
    hid = w1.shape[0]
    cout = w2.shape[0]

    # --- hoisted PrunedLinear channel masks (grid-invariant; tiny XLA ops) ---
    m1 = (jnp.mean(jnp.abs(w1), axis=0, keepdims=True) > 0.0).astype(jnp.float32)  # (1, C)
    m2 = (jnp.mean(jnp.abs(w2), axis=0, keepdims=True) > 0.0).astype(jnp.float32)  # (1, Hid)
    c_mask_mean = jnp.mean(m1).reshape(1)
    c_mask2_mean = jnp.mean(m2).reshape(1)

    # --- hidden-dim chunking (only pad Hid when it is actually chunked) ---
    if hid > 512:
        hid_chunk = 512
        hid_pad = _round_up(hid, hid_chunk)
    else:
        hid_chunk = hid
        hid_pad = hid
    num_chunks = hid_pad // hid_chunk

    # --- token tile: generation-aware default, 128-aligned, fits VMEM, >=2 programs ---
    dev_vmem = _device_vmem_bytes()
    if token_tile is None:
        token_tile = 1024 if dev_vmem >= (100 << 20) else 512   # v5e/v6e vs v7x
    hw128 = _round_up(hw, 128)
    tn = min(_round_up(token_tile, 128), hw128)
    if bs == 1 and _cdiv(hw, tn) < 2 and hw128 >= 256:
        tn = _round_up(_cdiv(hw128, 2), 128)      # split token axis across both v7x cores
    budget = int(0.75 * dev_vmem)
    while tn > 128 and _estimate_vmem(c, hid_pad, hid_chunk, cout, tn) + (4 << 20) > budget:
        tn -= 128
    est = _estimate_vmem(c, hid_pad, hid_chunk, cout, tn)
    vmem_limit = int(max(32 << 20, min(est + (4 << 20), budget)))

    # [B, C, H, W] -> [B, C, HW] is a free reshape; NO padding / extra HBM pass over x.
    x3 = x.reshape(bs, c, hw)

    # Pre-masked bf16 weights in original [out, in] orientation (no transpose),
    # zero-padded along Hid only when chunking requires it.
    w1m = w1 * m1
    w2m = w2 * m2
    b1v = b1
    if hid_pad != hid:
        w1m = jnp.pad(w1m, ((0, hid_pad - hid), (0, 0)))
        w2m = jnp.pad(w2m, ((0, 0), (0, hid_pad - hid)))
        b1v = jnp.pad(b1, (0, hid_pad - hid))
    w1p = w1m.astype(jnp.bfloat16)
    w2p = w2m.astype(jnp.bfloat16)
    b1p = b1v.reshape(hid_pad, 1).astype(jnp.float32)
    b2p = b2.reshape(cout, 1).astype(jnp.float32)

    grid = (bs, _cdiv(hw, tn))   # boundary token blocks are handled by masked stores

    in_specs = [
        pl.BlockSpec((1, c, tn), lambda b, t: (b, 0, t)),                 # x tile
        _resident_spec((hid_pad, c), lambda b, t: (0, 0)),                # masked W1
        _resident_spec((hid_pad, 1), lambda b, t: (0, 0)),                # b1
        _resident_spec((cout, hid_pad), lambda b, t: (0, 0)),             # masked W2
        _resident_spec((cout, 1), lambda b, t: (0, 0)),                   # b2
    ]
    out_specs = (
        pl.BlockSpec((1, cout, tn), lambda b, t: (b, 0, t)),              # y (channels-first)
        pl.BlockSpec((1, 1, tn), lambda b, t: (b, 0, t)),                 # token mask
    )
    out_shapes = (
        jax.ShapeDtypeStruct((bs, cout, hw), jnp.float32),                # unpadded: no crop
        jax.ShapeDtypeStruct((bs, 1, hw), jnp.float32),
    )

    kernel = functools.partial(_mlp2_kernel, hid_chunk=hid_chunk, num_chunks=num_chunks)
    y_full, tmask_full = pl.pallas_call(
        kernel,
        out_shape=out_shapes,
        grid=grid,
        in_specs=in_specs,
        out_specs=out_specs,
        compiler_params=pltpu.CompilerParams(
            dimension_semantics=("parallel", "parallel"),
            vmem_limit_bytes=vmem_limit,
        ),
    )(x3, w1p, b1p, w2p, b2p)

    # Outputs are already channels-first and unpadded; reshapes below are free.
    y = y_full.reshape(bs, cout, h, w)
    t_mask = tmask_full.reshape(bs, hw, 1)
    return y, t_mask, (c_mask_mean, c_mask2_mean)


def _reference_forward(x, w1, b1, w2, b2):
    """Pure-JAX f32 reference mirroring the torch module (sanity check)."""
    bs, c, h, w = x.shape
    xt = jnp.transpose(x.reshape(bs, c, -1), (0, 2, 1))                    # [B, L, C]
    t_mask = (jnp.mean(jnp.abs(xt), axis=2, keepdims=True) > 0.0).astype(jnp.float32)
    xt = xt * t_mask
    m1 = (jnp.mean(jnp.abs(w1), axis=0, keepdims=True) > 0.0).astype(jnp.float32)
    xt = xt @ (w1 * m1).T + b1
    xt = 0.5 * xt * (1.0 + lax.erf(xt * _INV_SQRT2))
    xt = xt * t_mask
    m2 = (jnp.mean(jnp.abs(w2), axis=0, keepdims=True) > 0.0).astype(jnp.float32)
    xt = xt @ (w2 * m2).T + b2
    y = jnp.transpose(xt, (0, 2, 1)).reshape(bs, -1, h, w)
    return y, t_mask, (jnp.mean(m1).reshape(1), jnp.mean(m2).reshape(1))


if __name__ == "__main__":
    B, C, H, W = 2, 4, 16, 16
    HID = 16  # hidden_features; out_features defaults to in_features = C

    key = jax.random.PRNGKey(0)
    kx, kw1, kb1, kw2, kb2 = jax.random.split(key, 5)
    x = jax.random.normal(kx, (B, C, H, W), dtype=jnp.float32)
    w1 = 0.02 * jax.random.normal(kw1, (HID, C), dtype=jnp.float32)
    b1 = 0.01 * jax.random.normal(kb1, (HID,), dtype=jnp.float32)
    w2 = 0.02 * jax.random.normal(kw2, (C, HID), dtype=jnp.float32)
    b2 = 0.01 * jax.random.normal(kb2, (C,), dtype=jnp.float32)

    y, t_mask, (cm1, cm2) = mlp2_forward(x, w1, b1, w2, b2)
    jax.block_until_ready((y, t_mask, cm1, cm2))

    y_ref, t_ref, (cm1_ref, cm2_ref) = _reference_forward(x, w1, b1, w2, b2)
    assert y.shape == (B, C, H, W) and t_mask.shape == (B, H * W, 1)
    # bf16 MXU path -> loose tolerance on y (re-validate / use f32 weights at large C, Hid);
    # masks are exact.
    assert jnp.allclose(y, y_ref, atol=2e-3, rtol=2e-2)
    assert jnp.allclose(t_mask, t_ref)
    assert jnp.allclose(cm1, cm1_ref) and jnp.allclose(cm2, cm2_ref)

    print("KERNEL_OK")
</pallas_src>

<mosaic_0001>
module attributes {stable_mosaic.version = 11 : i64} {
  func.func @_mlp2_kernel(%arg0: i32, %arg1: i32, %arg2: memref<1x4x256xf32, #tpu.memory_space<vmem>>, %arg3: memref<16x4xbf16, #tpu.memory_space<vmem>>, %arg4: memref<16x1xf32, #tpu.memory_space<vmem>>, %arg5: memref<4x16xbf16, #tpu.memory_space<vmem>>, %arg6: memref<4x1xf32, #tpu.memory_space<vmem>>, %arg7: memref<1x4x256xf32, #tpu.memory_space<vmem>>, %arg8: memref<1x1x256xf32, #tpu.memory_space<vmem>>) attributes {dimension_semantics = [#tpu.dimension_semantics<parallel>, #tpu.dimension_semantics<parallel>], iteration_bounds = array<i64: 2, 1>, scalar_prefetch = 0 : i64, scratch_operands = 0 : i64, tpu.core_type = #tpu.core_type<tc>, window_params = [{transform_indices = @transform_0, window_bounds = array<i64: 1, 4, 256>}, {pipeline_mode = #tpu.pipeline_mode<synchronous>, transform_indices = @transform_1, window_bounds = array<i64: 16, 4>}, {pipeline_mode = #tpu.pipeline_mode<synchronous>, transform_indices = @transform_2, window_bounds = array<i64: 16, 1>}, {pipeline_mode = #tpu.pipeline_mode<synchronous>, transform_indices = @transform_3, window_bounds = array<i64: 4, 16>}, {pipeline_mode = #tpu.pipeline_mode<synchronous>, transform_indices = @transform_4, window_bounds = array<i64: 4, 1>}, {transform_indices = @transform_5, window_bounds = array<i64: 1, 4, 256>}, {transform_indices = @transform_6, window_bounds = array<i64: 1, 1, 256>}]} {
    %c0 = arith.constant 0 : index
    %c0_0 = arith.constant 0 : index
    %c0_1 = arith.constant 0 : index
    %0 = vector.load %arg2[%c0, %c0_0, %c0_1] : memref<1x4x256xf32, #tpu.memory_space<vmem>>, vector<1x4x256xf32>
    %1 = vector.shape_cast %0 : vector<1x4x256xf32> to vector<4x256xf32>
    %2 = math.absf %1 : vector<4x256xf32>
    %cst = arith.constant dense<0.000000e+00> : vector<256xf32>
    %3 = vector.multi_reduction <add>, %2, %cst [0] : vector<4x256xf32> to vector<256xf32>
    %4 = vector.shape_cast %3 : vector<256xf32> to vector<1x256xf32>
    %cst_2 = arith.constant 0.000000e+00 : f32
    %5 = vector.broadcast %cst_2 : f32 to vector<1x256xf32>
    %6 = arith.cmpf ogt, %4, %5 : vector<1x256xf32>
    %7 = arith.extui %6 : vector<1x256xi1> to vector<1x256xi32>
    %8 = arith.sitofp %7 : vector<1x256xi32> to vector<1x256xf32>
    %c0_3 = arith.constant 0 : index
    %c0_4 = arith.constant 0 : index
    %c0_5 = arith.constant 0 : index
    %9 = vector.load %arg8[%c0_3, %c0_4, %c0_5] : memref<1x1x256xf32, #tpu.memory_space<vmem>>, vector<1x1x256xf32>
    %10 = vector.shape_cast %9 : vector<1x1x256xf32> to vector<1x256xf32>
    %11 = vector.shape_cast %8 : vector<1x256xf32> to vector<1x1x256xf32>
    tpu.vector_store %arg8[%c0_3, %c0_4, %c0_5], %11 {strides = array<i32>} : memref<1x1x256xf32, #tpu.memory_space<vmem>>, vector<1x1x256xf32>,
    %12 = vector.broadcast %8 : vector<1x256xf32> to vector<4x256xf32>
    %13 = arith.mulf %1, %12 : vector<4x256xf32>
    %14 = arith.truncf %13 : vector<4x256xf32> to vector<4x256xbf16>
    %c0_6 = arith.constant 0 : index
    %c0_7 = arith.constant 0 : index
    %15 = vector.load %arg6[%c0_6, %c0_7] : memref<4x1xf32, #tpu.memory_space<vmem>>, vector<4x1xf32>
    %16 = vector.shape_cast %15 : vector<4x1xf32> to vector<4x1xf32>
    %17 = vector.broadcast %16 : vector<4x1xf32> to vector<4x256xf32>
    %c0_8 = arith.constant 0 : index
    %c0_9 = arith.constant 0 : index
    %18 = vector.load %arg3[%c0_8, %c0_9] : memref<16x4xbf16, #tpu.memory_space<vmem>>, vector<16x4xbf16>
    %cst_10 = arith.constant dense<0.000000e+00> : vector<16x256xf32>
    %19 = tpu.matmul %18, %14, %cst_10 {dimension_numbers = #tpu.dot_dimension_numbers<[1], [0], [0], [1], [0, 0, 1, 1], [], []>} : vector<16x4xbf16>, vector<4x256xbf16>, vector<16x256xf32> -> vector<16x256xf32>
    %c0_11 = arith.constant 0 : index
    %c0_12 = arith.constant 0 : index
    %20 = vector.load %arg4[%c0_11, %c0_12] : memref<16x1xf32, #tpu.memory_space<vmem>>, vector<16x1xf32>
    %21 = vector.broadcast %20 : vector<16x1xf32> to vector<16x256xf32>
    %22 = arith.addf %19, %21 : vector<16x256xf32>
    %cst_13 = arith.constant 5.000000e-01 : f32
    %23 = vector.broadcast %cst_13 : f32 to vector<16x256xf32>
    %24 = arith.mulf %23, %22 : vector<16x256xf32>
    %cst_14 = arith.constant 0.707106769 : f32
    %25 = vector.broadcast %cst_14 : f32 to vector<16x256xf32>
    %26 = arith.mulf %22, %25 : vector<16x256xf32>
    %27 = math.erf %26 : vector<16x256xf32>
    %cst_15 = arith.constant 1.000000e+00 : f32
    %28 = vector.broadcast %cst_15 : f32 to vector<16x256xf32>
    %29 = arith.addf %28, %27 : vector<16x256xf32>
    %30 = arith.mulf %24, %29 : vector<16x256xf32>
    %31 = vector.broadcast %8 : vector<1x256xf32> to vector<16x256xf32>
    %32 = arith.mulf %30, %31 : vector<16x256xf32>
    %33 = arith.truncf %32 : vector<16x256xf32> to vector<16x256xbf16>
    %c0_16 = arith.constant 0 : index
    %c0_17 = arith.constant 0 : index
    %34 = vector.load %arg5[%c0_16, %c0_17] : memref<4x16xbf16, #tpu.memory_space<vmem>>, vector<4x16xbf16>
    %cst_18 = arith.constant dense<0.000000e+00> : vector<4x256xf32>
    %35 = tpu.matmul %34, %33, %cst_18 {dimension_numbers = #tpu.dot_dimension_numbers<[1], [0], [0], [1], [0, 0, 1, 1], [], []>} : vector<4x16xbf16>, vector<16x256xbf16>, vector<4x256xf32> -> vector<4x256xf32>
    %36 = arith.addf %17, %35 : vector<4x256xf32>
    %c0_19 = arith.constant 0 : index
    %c0_20 = arith.constant 0 : index
    %c0_21 = arith.constant 0 : index
    %37 = vector.load %arg7[%c0_19, %c0_20, %c0_21] : memref<1x4x256xf32, #tpu.memory_space<vmem>>, vector<1x4x256xf32>
    %38 = vector.shape_cast %37 : vector<1x4x256xf32> to vector<4x256xf32>
    %39 = vector.shape_cast %36 : vector<4x256xf32> to vector<1x4x256xf32>
    tpu.vector_store %arg7[%c0_19, %c0_20, %c0_21], %39 {strides = array<i32>} : memref<1x4x256xf32, #tpu.memory_space<vmem>>, vector<1x4x256xf32>,
    return
  }
  func.func @transform_0(%arg0: i32, %arg1: i32) -> (i32, i32, i32) {
    %c0_i32 = arith.constant 0 : i32
    %c0_i32_0 = arith.constant 0 : i32
    return %arg0, %c0_i32, %arg1 : i32, i32, i32
  }
  func.func @transform_1(%arg0: i32, %arg1: i32) -> (i32, i32) {
    %c0_i32 = arith.constant 0 : i32
    %c0_i32_0 = arith.constant 0 : i32
    %c0_i32_1 = arith.constant 0 : i32
    return %c0_i32, %c0_i32_0 : i32, i32
  }
  func.func @transform_2(%arg0: i32, %arg1: i32) -> (i32, i32) {
    %c0_i32 = arith.constant 0 : i32
    %c0_i32_0 = arith.constant 0 : i32
    %c0_i32_1 = arith.constant 0 : i32
    return %c0_i32, %c0_i32_0 : i32, i32
  }
  func.func @transform_3(%arg0: i32, %arg1: i32) -> (i32, i32) {
    %c0_i32 = arith.constant 0 : i32
    %c0_i32_0 = arith.constant 0 : i32
    %c0_i32_1 = arith.constant 0 : i32
    return %c0_i32, %c0_i32_0 : i32, i32
  }
  func.func @transform_4(%arg0: i32, %arg1: i32) -> (i32, i32) {
    %c0_i32 = arith.constant 0 : i32
    %c0_i32_0 = arith.constant 0 : i32
    %c0_i32_1 = arith.constant 0 : i32
    return %c0_i32, %c0_i32_0 : i32, i32
  }
  func.func @transform_5(%arg0: i32, %arg1: i32) -> (i32, i32, i32) {
    %c0_i32 = arith.constant 0 : i32
    %c0_i32_0 = arith.constant 0 : i32
    return %arg0, %c0_i32, %arg1 : i32, i32, i32
  }
  func.func @transform_6(%arg0: i32, %arg1: i32) -> (i32, i32, i32) {
    %c0_i32 = arith.constant 0 : i32
    %c0_i32_0 = arith.constant 0 : i32
    return %arg0, %c0_i32, %arg1 : i32, i32, i32
  }
}

</mosaic_0001>

<bundles_post_ra>
// kernel: mlp2_forward.1
= control target key start
LH: loop header
LB: loop body
LE: loop exit
PB: predicated region body
PF: predicated region fallthrough
CT: control target
= control target key end

     0   :  { %12 = vsyncpa [#allocation3], 0  ;;  %s1010_s0 = inlined_call_operand.vmem [shape: f32[2,4,256], index: 0, kind: input, shape index: {}]   ;;  %s1011_s1 = inlined_call_operand.vmem [shape: bf16[16,4], index: 1, kind: input, shape index: {}]   ;;  %s1012_s2 = inlined_call_operand.vmem [shape: f32[16,1], index: 2, kind: input, shape index: {}]   ;;  %s1013_s3 = inlined_call_operand.vmem [shape: bf16[4,16], index: 3, kind: input, shape index: {}]   ;;  %s1014_s4 = inlined_call_operand.vmem [shape: f32[4,1], index: 4, kind: input, shape index: {}]   ;;  %s1015_s5 = inlined_call_operand.vmem [shape: f32[2,4,256], index: 5, kind: output, shape index: {0}]   ;;  %s1016_s6 = inlined_call_operand.hbm [shape: f32[2,1,256], index: 6, kind: output, shape index: {1}]  }
   0x1   :  { %14 = vsyncpa [#allocation3 + $0x1], 0  ;;  %s875_s21 = smov 0   ;;  %s877_s22 = smov 0  }
   0x2   :  { %s879_s23 = smov 0   ;;  %s881_s24 = smov 0  }
   0x3   :  { %s883_s25 = smov 0   ;;  %s885_s26 = smov 0  }
   0x4 LB: > { %s663_s27 = sadd.s32 4294967295, %s834_s26   ;;  %s664_s28 = sadd.s32 4294967294, %s834_s26   ;;  %s834_s26 = sphi %s885_s26, %s20_s26   ;;  %s830_s25 = sphi %s883_s25, %s1025_s25   ;;  %s826_s24 = sphi %s881_s24, %s1024_s24   ;;  %s822_s23 = sphi %s879_s23, %s1023_s23   ;;  %s818_s22 = sphi %s877_s22, %s1022_s22   ;;  %s814_s21 = sphi %s875_s21, %s1021_s21  }
   0x5   : > { %s32_s29 = sadd.s32 1, %s830_s25  ;;  %s181_s30 = sadd.s32 1, %s822_s23 }
   0x6   : > { %p34_p0 = scmp.ge.s32.totalorder %s32_s29, 2  ;;  %p191_p1 = scmp.ne.s32.totalorder %s822_s23, %s818_s22 }
   0x7   : > { %p192_p2 = scmp.eq.s32.totalorder %s663_s27, 1  ;;  %p197_p3 = scmp.ne.s32.totalorder %s818_s22, %s814_s21 }
   0x8   : > { %s1027_s29 = smov (%p34_p0, %s32_s29), 0  ;;  %p198_p5 = scmp.eq.s32.totalorder %s664_s28, 1 }
   0x9   : > { %p915_p4 = por %p192_p2, %p191_p1  ;;  %s176_s8 = ssub.s32 %s830_s25, %s1027_s29 }
   0xa   : > { %p667_p6 = scmp.ge.s32.totalorder %s834_s26, 1  ;;  %p179_p7 = scmp.eq.s32.totalorder %s176_s8, 0 }
   0xb   : > { %p922_p8 = por %p198_p5, %p197_p3  ;;  %p241_p9 = scmp.lt.s32.totalorder %s834_s26, 3 }
   0xc   : > { %s928_s10 = scalar_select %p179_p7, %s822_s23, %s181_s30  }
   0xd   : > { %p242_p10 = pnand %p667_p6, %p241_p9 }
   0xe   : > { %p285_p11 = scmp.lt.s32.totalorder (!%p242_p10), %s826_s24, 1  ;;  %v836_v0 = vmov (!%p242_p10), 0   ;;  %v370_v1 = vld [vmem:[%s1012_s2] sm:$0xff] (!%p242_p10)  ;;  %v371_v2 = vld [vmem:[%s1012_s2 + $0x8] sm:$0xff] (!%p242_p10)  ;;  %vm311_vm0 = vcmask (!%p242_p10), 1043456   ;;  %v837_v20 = vmov (!%p242_p10), 0.0  }
   0xf   : > { %245 = sbr.rel (%p242_p10) target bundleno = 518 (0x206), region = 40  ;;  %430 = vmatprep.mubr.bf16.mxu0 (!%p242_p10), %v836_v0  ;;  %745 = vset.pattern.permute.xlu0 (!%p242_p10), %v836_v0  ;;  %vm391_vm3 = vcmask (!%p242_p10), 1041408   ;;  %v747_v29 = vld [vmem:[%s1011_s1] sm:$0xff] (!%p242_p10)   ;;  %vm387_vm4 = vcmask (!%p242_p10), 31744   ;;  %vm468_vm5 = vcmask (!%p242_p10), 130048   ;;  %s281_s12 = sand.u32 (!%p242_p10), 1, %s818_s22  }
  0x10   : > { %374 = vperm.xlu0 (!%p242_p10), %745, %v370_v1   ;;  %504 = vmatprep.mubr.bf16.mxu1 (!%p242_p10), %v836_v0  ;;  %v362_v30 = vld [vmem:[%s1014_s4] sm:$0xf] (!%p242_p10)  ;;  %s668_s14 = sshll.u32 (!%p242_p10), %s281_s12, 1  ;;  %s686_s15 = sshll.u32 (!%p242_p10), %s826_s24, 5 }
  0x11   : > { %746 = vset.pattern.permute.xlu1 (!%p242_p10), %v836_v0  ;;  %s283_s17 = scalar_lea.vmem (!%p242_p10), [#allocation2], %s668_s14  ;;  %s964_s27 = scalar_lea.hbm (!%p242_p10), %s1016_s6, %s686_s15 }
  0x12   : > { %365 = vperm.xlu1 (!%p242_p10), %746, %v362_v30   ;;  %s550_s18 = sshll.u32 (!%p242_p10), %s283_s17, 4  ;;  %s530_s28 = scalar_lea.sflag (!%p242_p10), [#allocation3], %s281_s12  ;;  %s551_s18 = int_to_ptr.vmem [resolvable:$true] %s550_s18 }
  0x13   : > { %s756_s30 = scalar_lea.vmem (!%p242_p10), %s551_s18, 32  ;;  %s839_s8 = smov (!%p242_p10), [#allocation2]  }
  0x14   : > { %379 = vperm.xlu0 (!%p242_p10), %745, %v371_v2   ;;  %p757_p12 = scmp.ne.s32.totalorder (!%p242_p10), %s551_s18, %s756_s30  ;;  %s760_s11 = sshll.u32 (!%p242_p10), %s839_s8, 4  ;;  %s761_s11 = int_to_ptr.vmem [resolvable:$false] %s760_s11 }
  0x15   : > { %p763_p1 = scmp.lt.s32.totalorder (!%p242_p10), %s551_s18, %s761_s11 }
  0x16   : > { %s935_s13 = scalar_select %p285_p11, %s826_s24, 1 }
  0x17   : > { %p758_p13 = pnand %p757_p12, %p915_p4 }
  0x18   : > { %s1017_s16 = sshll.u32 %s935_s13, 3 }
  0x19   : > { %s292_s19 = scalar_lea.vmem %s1010_s0, %s1017_s16  ;;  %p759_p0 = pneg %p758_p13 }
  0x1a   : > { %v306_v3 = vld [vmem:[%s292_s19] sm:$0xff]  ;;  %s762_s16 = scalar_lea.vmem %s761_s11, 64 }
  0x1b   : > { %v307_v4 = vand.u32 2147483647, %v306_v3  ;;  %p764_p2 = scmp.lt.s32.totalorder %s762_s16, %s756_s30 }
  0x1d   : > { %v309_v5 = vcombine.high %v307_v4, %v307_v4  ;;  %v312_v6 = vsel %vm311_vm0, %v307_v4, 0.0  ;;  %v838_v4 = vmov 1966171168   ;;  %p765_p3 = por %p764_p2, %p763_p1 }
  0x1e   : > { %v313_v7 = vrot.slane %v312_v6, 4 }
  0x1f   : > { %v319_v8 = vsel %vm311_vm0, %v309_v5, 0.0  ;;  %v336_v5 = vunpack.c.l.s4 %v838_v4  ;;  %p766_p5 = pnand %p765_p3, %p759_p0 }
  0x20   : > { %v314_v9 = vadd.f32 %v313_v7, %v312_v6  ;;  %v320_v10 = vrot.slane %v319_v8, 4  ;;  %v338_v6 = vlaneseq }
  0x21   : > { %v337_v7 = vunpack.c.0.s8 %v336_v5 }
  0x22   : > { %v315_v11 = vrot.slane %v314_v9, 2  ;;  %v321_v12 = vadd.f32 %v320_v10, %v319_v8  ;;  %v339_v8 = vshrl.u32 %v338_v6, 7  ;;  %vm352_vm6 = vcmp.lt.s32.totalorder %v338_v6, 256 }
  0x24   : > { %v316_v13 = vadd.f32 %v315_v11, %v314_v9  ;;  %v322_v14 = vrot.slane %v321_v12, 2  ;;  %v340_v9 = vsub.s32 %v337_v7, %v339_v8 }
  0x26   : > { %v317_v15 = vrot.slane %v316_v13, 1  ;;  %v323_v16 = vadd.f32 %v322_v14, %v321_v12 }
  0x28   : > { %v318_v17 = vadd.f32 %v317_v15, %v316_v13  ;;  %v324_v18 = vrot.slane %v323_v16, 1 }
  0x2a   : > { %v325_v19 = vadd.f32 %v324_v18, %v323_v16  ;;  %vm326_vm1 = vcmp.gt.f32.partialorder %v318_v17, 0.0 }
  0x2b   : > { %v673_v21 = vsel %vm326_vm1, 1.0, %v837_v20 }
  0x2c   : > { %vm327_vm2 = vcmp.gt.f32.partialorder %v325_v19, 0.0 }
  0x2d   : > { %v674_v22 = vsel %vm327_vm2, 1.0, %v837_v20 }
  0x2e   : > { %v946_v23 = vcombine.low %v673_v21, %v674_v22 }
  0x30   : > { %v356_v24 = vmul.f32 %v946_v23, %v306_v3  ;;  %v467_v3 = vld [vmem:[%s1013_s3] sm:$0x3]  ;;  %v341_v10 = vrot.slane %v946_v23, %v340_v9 }
  0x32   : > { %v358_v25 = vcombine.high %v356_v24, %v356_v24  ;;  %v360_v26 = vpack.c.bf16 %v356_v24, %v356_v24  ;;  %v348_v11 = vrot.slane %v341_v10, %v340_v9 }
  0x34   : > { %v361_v27 = vpack.c.bf16 %v358_v25, %v358_v25  ;;  %v393_v28 = vsel %vm391_vm3, %v360_v26, 0  ;;  %354 = vst.msk [vmem:[%s283_s17] sm:$0x3] %vm352_vm6, %v348_v11 }
  0x36   : > { %676 = vmatprep.subr.msk.bf16.mxu0 %vm391_vm3, %v361_v27 }
  0x37   : > { %399 = vmatpush1.bf16.msra.mxu0 %v393_v28 }
  0x3a   : > { %677 = vmatmul.mubr.msk.bf16.vlgmr.msra.gmra.mrb[0].mxu0 %vm387_vm4, %v747_v29 }
  0x8f   : > { %v375_v31 = vpop.permute.xlu0 %374 }
  0x93   : > { %v380_v35 = vpop.permute.xlu0 %379 }
 0x10d   : > { %v432_v32 = vpop.f32.mrb[0].mxu0 }
 0x10e   : > { %v433_v33 = vadd.f32 %v432_v32, %v375_v31  ;;  %v434_v34 = vpop.f32.mrb[1].mxu0 }
 0x10f   : > { %v435_v36 = vadd.f32 %v434_v34, %v375_v31  ;;  %v436_v37 = vpop.f32.mrb[2].mxu0 }
 0x110   : > { %v445_v38 = vmul.f32 0.70710677, %v433_v33  ;;  %v437_v39 = vadd.f32 %v436_v37, %v380_v35  ;;  %v438_v40 = vpop.f32.mrb[3].mxu0  ;;  %v441_v47 = vmul.f32 0.5, %v433_v33 }
 0x111   : > { %v446_v41 = vmul.f32 0.70710677, %v435_v36  ;;  %v439_v42 = vadd.f32 %v438_v40, %v380_v35  ;;  %v442_v50 = vmul.f32 0.5, %v435_v36 }
 0x112   : > { %748 = verf.f32 %v445_v38  ;;  %v447_v43 = vmul.f32 0.70710677, %v437_v39  ;;  %v443_v54 = vmul.f32 0.5, %v437_v39 }
 0x113   : > { %750 = verf.f32 %v446_v41  ;;  %v448_v44 = vmul.f32 0.70710677, %v439_v42  ;;  %v444_v56 = vmul.f32 0.5, %v439_v42 }
 0x114   : > { %752 = verf.f32 %v447_v43 }
 0x115   : > { %754 = verf.f32 %v448_v44 }
 0x11c   : > { %v749_v45 = vpop.eup %748 }
 0x11d   : > { %v751_v46 = vpop.eup %750  ;;  %v453_v48 = vadd.f32 1.0, %v749_v45 }
 0x11e   : > { %v753_v49 = vpop.eup %752  ;;  %v454_v51 = vadd.f32 1.0, %v751_v46 }
 0x11f   : > { %v755_v52 = vpop.eup %754  ;;  %v457_v53 = vmul.f32 %v453_v48, %v441_v47  ;;  %v455_v55 = vadd.f32 1.0, %v753_v49 }
 0x120   : > { %v456_v57 = vadd.f32 1.0, %v755_v52  ;;  %v458_v58 = vmul.f32 %v454_v51, %v442_v50 }
 0x121   : > { %v459_v59 = vmul.f32 %v455_v55, %v443_v54  ;;  %v461_v61 = vmul.f32 %v673_v21, %v457_v53 }
 0x122   : > { %v460_v60 = vmul.f32 %v456_v57, %v444_v56  ;;  %v462_v63 = vmul.f32 %v674_v22, %v458_v58 }
 0x123   : > { %v463_v62 = vmul.f32 %v673_v21, %v459_v59 }
 0x124   : > { %v464_v0 = vmul.f32 %v674_v22, %v460_v60 }
 0x125   : > { %v465_v1 = vpack.c.bf16 %v463_v62, %v461_v61 }
 0x126   : > { %v466_v2 = vpack.c.bf16 %v464_v0, %v462_v63 }
 0x128   : > { %472 = vmatprep.subr.bf16.mxu1 %v466_v2 }
 0x129   : > { %473 = vmatpush1.bf16.msra.mxu1 %v465_v1 }
 0x12c   : > { %678 = vmatmul.mubr.msk.bf16.vlgmr.msra.gmra.mrb[0].mxu1 %vm468_vm5, %v467_v3 }
 0x12d   : > { %769 = shalt.err (!%p766_p5)
}
 0x12e   : > { %s770_s24 = scalar_lea.hbm %s964_s27, 32  ;;  %s774_s15 = scalar_lea.hbm %s1016_s6, 64 }
 0x12f   : > { %p771_p6 = scmp.ne.s32.totalorder %s964_s27, %s770_s24  ;;  %p775_p10 = scmp.lt.u32.totalorder %s964_s27, %s1016_s6 }
 0x130   : > { %p776_p11 = scmp.lt.u32.totalorder %s774_s15, %s770_s24  ;;  %p778_p13 = scmp.lt.u32.totalorder %s770_s24, %s964_s27 }
 0x131   : > { %p772_p7 = pnand %p771_p6, %p915_p4 }
 0x132   : > { %p777_p12 = por %p776_p11, %p775_p10 }
 0x133   : > { %p773_p9 = pneg %p772_p7 }
 0x134   : > { %p779_p0 = por %p778_p13, %p777_p12 }
 0x136   : > { %p780_p1 = pnand %p779_p0, %p773_p9 }
 0x138   : > { %783 = shalt.err (!%p780_p1)
}
 0x139   : > { %687 = dma.vmem_to_hbm [thread:$0]  (%p915_p4), %s551_s18, 32, %s964_s27, %s530_s28   ;;  %v366_v12 = vpop.permute.xlu1 %365 }
 0x13a   : > { %s1020_s16 = sshll.u32 %s935_s13, 3 }
 0x13b   : > { %s302_s8 = scalar_lea.vmem %s1015_s5, %s1020_s16 }
 0x1ff   : > { %v506_v13 = vpop.f32.mrb[0].mxu1 }
 0x200   : > { %v513_v14 = vadd.f32 %v506_v13, %v366_v12  ;;  %v508_v15 = vpop.f32.mrb[1].mxu1 }
 0x201   : > { %v514_v16 = vadd.f32 %v508_v15, %v366_v12  ;;  %v510_v17 = vpop.f32.mrb[2].mxu1 }
 0x202   : > { %v511_v18 = vpop.f32.mrb[3].mxu1 }
 0x203   : > { %v517_v19 = vcombine.low %v513_v14, %v514_v16 }
 0x205   : > { %519 = vst [vmem:[%s302_s8] sm:$0xff] %v517_v19 }
 0x206 PF: > { %p693_p2 = scmp.ge.s32.totalorder %s834_s26, 2  ;;  %s574_s7 = sand.u32 1, %s814_s21  }
 0x207   : > { %s575_s18 = scalar_lea.sflag [#allocation3], %s574_s7 }
 0x208   : > { %p690_p4 = pnand %p693_p2, %p922_p8 }
 0x20a   : > { %809 = dma.done.wait (!%p690_p4), %s575_s18, 32  }
 0x20b   : > { %811 = vsyncadd (!%p690_p4), %s575_s18, 4294967264  ;;  %s20_s26 = sadd.s32 1, %s834_s26   ;;  %s1021_s21 = smov %s818_s22 }
 0x20c   : > { %p17_p3 = scmp.ge.s32.totalorder %s20_s26, 4   ;;  %s1022_s22 = smov %s822_s23 }
 0x20d   : > { %s1023_s23 = smov %s928_s10  ;;  %s1024_s24 = smov %s830_s25 }
 0x20e   : > { %s1025_s25 = smov %s1027_s29  ;;  %19 = sbr.rel (!%p17_p3) target bundleno = 4 (0x4), region = 87 }
 0x215   :  { %580 = vsyncpa [#allocation3], 1 }
 0x216   :  { %582 = vsyncpa [#allocation3 + $0x1], 1 }

</bundles_post_ra>
